<compile_context>
chip_gen: v7x
topology: tpu7x:2x2x1
jax: 0.10.0
libtpu: 0.0.40
codegen_flags: <defaults>
</compile_context>

<pallas_src>
import jax
import jax.numpy as jnp
from jax.experimental import pallas as pl
from jax.experimental.pallas import tpu as pltpu


def _full_expertise_kernel(x_ref, w_ref, b_ref, v_ref, out_ref, res_ref):
    # out = x @ W + b   (MXU matmul, f32 accumulation)
    out = jnp.dot(x_ref[...], w_ref[...], preferred_element_type=jnp.float32)
    out = out + b_ref[...]                      # broadcast (1, A_pad) over rows
    out_ref[...] = out.astype(out_ref.dtype)

    # result = sum(out * v, axis=1)  (VPU mul + XLU lane reduction; padded
    # lanes of v are zero so they do not contribute).
    res = jnp.sum(out * v_ref[...], axis=1, keepdims=True)
    res_ref[...] = res.astype(res_ref.dtype)


def full_expertise_forward(x, W, b, v, *, block_b=512):
    """x: [B, dim], W: [dim, A], b: [A], v: [B, A] -> (result [B], out [B, A])."""
    B, dim = x.shape
    A = W.shape[1]

    # Lane-dense annotator axis: zero-pad A up to a multiple of 128.
    A_pad = max(128, ((A + 127) // 128) * 128)
    pad_a = A_pad - A
    xp = x.astype(jnp.float32)
    Wp = jnp.pad(W.astype(jnp.float32), ((0, 0), (0, pad_a)))
    bp = jnp.pad(b.astype(jnp.float32).reshape(1, A), ((0, 0), (0, pad_a)))
    vp = jnp.pad(v.astype(jnp.float32), ((0, 0), (0, pad_a)))

    if B <= block_b:
        # Tiny problem: no grid, no pipeline — everything lives in VMEM.
        vmem = pl.BlockSpec(memory_space=pltpu.MemorySpace.VMEM)
        out_p, res = pl.pallas_call(
            _full_expertise_kernel,
            out_shape=(
                jax.ShapeDtypeStruct((B, A_pad), jnp.float32),
                jax.ShapeDtypeStruct((B, 1), jnp.float32),
            ),
            in_specs=[vmem, vmem, vmem, vmem],
            out_specs=(vmem, vmem),
        )(xp, Wp, bp, vp)
        return res[:, 0], out_p[:, :A]

    # Large batch: tile the batch axis; W/b stay resident across the grid.
    TB = block_b  # rows per tile; multiple of 8 (f32 sublane)
    assert TB % 8 == 0
    B_pad = ((B + TB - 1) // TB) * TB
    if B_pad != B:
        xp = jnp.pad(xp, ((0, B_pad - B), (0, 0)))
        vp = jnp.pad(vp, ((0, B_pad - B), (0, 0)))

    grid = (B_pad // TB,)
    out_p, res = pl.pallas_call(
        _full_expertise_kernel,
        out_shape=(
            jax.ShapeDtypeStruct((B_pad, A_pad), jnp.float32),
            jax.ShapeDtypeStruct((B_pad, 1), jnp.float32),
        ),
        grid_spec=pltpu.PrefetchScalarGridSpec(
            num_scalar_prefetch=0,
            grid=grid,
            in_specs=[
                pl.BlockSpec((TB, dim), lambda i: (i, 0)),
                pl.BlockSpec((dim, A_pad), lambda i: (0, 0)),   # VMEM-resident
                pl.BlockSpec((1, A_pad), lambda i: (0, 0)),     # VMEM-resident
                pl.BlockSpec((TB, A_pad), lambda i: (i, 0)),
            ],
            out_specs=[
                pl.BlockSpec((TB, A_pad), lambda i: (i, 0)),
                pl.BlockSpec((TB, 1), lambda i: (i, 0)),
            ],
        ),
        compiler_params=pltpu.CompilerParams(
            dimension_semantics=("parallel",)),   # 2x on v7x (2 TCs)
    )(xp, Wp, bp, vp)

    return res[:B, 0], out_p[:B, :A]


def init_params(dim, annotators, key):
    """Deterministic stand-in for the 21 nn.Linear(dim, 1) heads (stacked)."""
    kw, kb = jax.random.split(key)
    bound = 1.0 / jnp.sqrt(dim)
    # Column i == weight of Annotator{i}
    W = jax.random.uniform(kw, (dim, annotators), jnp.float32, -bound, bound)
    b = jax.random.uniform(kb, (annotators,), jnp.float32, -bound, bound)
    return W, b


if __name__ == "__main__":
    annotators = 21
    dim = 32

    key = jax.random.PRNGKey(0)
    kx, kv, kp, kx2, kv2 = jax.random.split(key, 5)
    W, b = init_params(dim, annotators, kp)

    # ---- small-batch path (no grid, whole arrays in VMEM) ----
    B = 8
    x = jax.random.normal(kx, (B, dim), jnp.float32)
    v = jax.random.normal(kv, (B, annotators), jnp.float32)

    result, out = full_expertise_forward(x, W, b, v)
    jax.block_until_ready((result, out))

    out_ref = x @ W + b
    result_ref = jnp.sum(out_ref * v, axis=1)
    assert out.shape == (B, annotators)
    assert result.shape == (B,)
    assert jnp.allclose(out, out_ref, atol=1e-5), "out mismatch (small path)"
    assert jnp.allclose(result, result_ref, atol=1e-4), "result mismatch (small path)"

    # ---- tiled-batch path (grid over batch, parallel semantics) ----
    B2, TB = 600, 256   # B2 not a tile multiple -> exercises row padding
    x2 = jax.random.normal(kx2, (B2, dim), jnp.float32)
    v2 = jax.random.normal(kv2, (B2, annotators), jnp.float32)

    result2, out2 = full_expertise_forward(x2, W, b, v2, block_b=TB)
    jax.block_until_ready((result2, out2))

    out2_ref = x2 @ W + b
    result2_ref = jnp.sum(out2_ref * v2, axis=1)
    assert out2.shape == (B2, annotators)
    assert result2.shape == (B2,)
    assert jnp.allclose(out2, out2_ref, atol=1e-5), "out mismatch (tiled path)"
    assert jnp.allclose(result2, result2_ref, atol=1e-4), "result mismatch (tiled path)"

    print("KERNEL_OK")
</pallas_src>

<mosaic_0001>
module attributes {stable_mosaic.version = 11 : i64} {
  func.func @_full_expertise_kernel(%arg0: memref<8x32xf32, #tpu.memory_space<vmem>>, %arg1: memref<32x128xf32, #tpu.memory_space<vmem>>, %arg2: memref<1x128xf32, #tpu.memory_space<vmem>>, %arg3: memref<8x128xf32, #tpu.memory_space<vmem>>, %arg4: memref<8x128xf32, #tpu.memory_space<vmem>>, %arg5: memref<8x1xf32, #tpu.memory_space<vmem>>) attributes {dimension_semantics = [], scalar_prefetch = 0 : i64, scratch_operands = 0 : i64, tpu.core_type = #tpu.core_type<tc>} {
    %c0 = arith.constant 0 : index
    %c0_0 = arith.constant 0 : index
    %0 = vector.load %arg0[%c0, %c0_0] : memref<8x32xf32, #tpu.memory_space<vmem>>, vector<8x32xf32>
    %c0_1 = arith.constant 0 : index
    %c0_2 = arith.constant 0 : index
    %1 = vector.load %arg1[%c0_1, %c0_2] : memref<32x128xf32, #tpu.memory_space<vmem>>, vector<32x128xf32>
    %cst = arith.constant dense<0.000000e+00> : vector<8x128xf32>
    %2 = tpu.matmul %0, %1, %cst {dimension_numbers = #tpu.dot_dimension_numbers<[1], [0], [0], [1], [0, 0, 1, 1], [], []>} : vector<8x32xf32>, vector<32x128xf32>, vector<8x128xf32> -> vector<8x128xf32>
    %c0_3 = arith.constant 0 : index
    %c0_4 = arith.constant 0 : index
    %3 = vector.load %arg2[%c0_3, %c0_4] : memref<1x128xf32, #tpu.memory_space<vmem>>, vector<1x128xf32>
    %4 = vector.broadcast %3 : vector<1x128xf32> to vector<8x128xf32>
    %5 = arith.addf %2, %4 : vector<8x128xf32>
    %c0_5 = arith.constant 0 : index
    %c0_6 = arith.constant 0 : index
    %6 = vector.load %arg4[%c0_5, %c0_6] : memref<8x128xf32, #tpu.memory_space<vmem>>, vector<8x128xf32>
    tpu.vector_store %arg4[%c0_5, %c0_6], %5 {strides = array<i32>} : memref<8x128xf32, #tpu.memory_space<vmem>>, vector<8x128xf32>,
    %c0_7 = arith.constant 0 : index
    %c0_8 = arith.constant 0 : index
    %7 = vector.load %arg3[%c0_7, %c0_8] : memref<8x128xf32, #tpu.memory_space<vmem>>, vector<8x128xf32>
    %8 = arith.mulf %5, %7 : vector<8x128xf32>
    %cst_9 = arith.constant dense<0.000000e+00> : vector<8xf32>
    %9 = vector.multi_reduction <add>, %8, %cst_9 [1] : vector<8x128xf32> to vector<8xf32>
    %10 = vector.shape_cast %9 : vector<8xf32> to vector<8x1xf32>
    %c0_10 = arith.constant 0 : index
    %c0_11 = arith.constant 0 : index
    %11 = vector.load %arg5[%c0_10, %c0_11] : memref<8x1xf32, #tpu.memory_space<vmem>>, vector<8x1xf32>
    tpu.vector_store %arg5[%c0_10, %c0_11], %10 {strides = array<i32>} : memref<8x1xf32, #tpu.memory_space<vmem>>, vector<8x1xf32>,
    return
  }
}

</mosaic_0001>

<bundles_post_ra>
// kernel: tpu_custom_call.1
= control target key start
LH: loop header
LB: loop body
LE: loop exit
PB: predicated region body
PF: predicated region fallthrough
CT: control target
= control target key end

     0   :  { %11 = vsyncpa [#allocation3], 0  ;;  %s353_s0 = inlined_call_operand.hbm [shape: f32[8,32], index: 0, kind: input, shape index: {}]   ;;  %s354_s1 = inlined_call_operand.hbm [shape: f32[32,128], index: 1, kind: input, shape index: {}]   ;;  %s355_s2 = inlined_call_operand.vmem [shape: f32[1,128], index: 2, kind: input, shape index: {}]   ;;  %s356_s3 = inlined_call_operand.vmem [shape: f32[8,128], index: 3, kind: input, shape index: {}]   ;;  %s357_s4 = inlined_call_operand.hbm [shape: f32[8,128], index: 4, kind: output, shape index: {0}]   ;;  %s358_s5 = inlined_call_operand.vmem [shape: f32[8,1], index: 5, kind: output, shape index: {1}]  }
   0x1   :  { %12 = vsyncpa [#allocation6], 0 }
   0x2   :  { %13 = vsyncpa [#allocation4], 0  ;;  %s263_s18 = smov [#allocation2]   ;;  %s264_s20 = smov [#allocation5]  }
   0x3   :  { %s20_s19 = sshll.u32 %s263_s18, 4  ;;  %s29_s21 = sshll.u32 %s264_s20, 4  ;;  %s21_s19 = int_to_ptr.vmem [resolvable:$true] %s20_s19  ;;  %s301_s21 = int_to_ptr.vmem [resolvable:$true] %s29_s21 }
   0x4   :  { %s191_s24 = scalar_lea.hbm %s353_s0, 128 }
   0x5   :  { %p192_p0 = scmp.ne.s32.totalorder %s353_s0, %s191_s24  ;;  %p195_p1 = scmp.lt.u32.totalorder %s191_s24, %s353_s0 }
   0x7   :  { %p197_p2 = pnand %p195_p1, %p192_p0 }
   0x9   :  { %200 = shalt.err (!%p197_p2)
}
   0xa   :  { %s201_s29 = scalar_lea.vmem %s21_s19, 128  ;;  %p206_p4 = scmp.lt.s32.totalorder %s21_s19, %s21_s19 }
   0xb   :  { %p202_p3 = scmp.ne.s32.totalorder %s21_s19, %s201_s29  ;;  %p207_p5 = scmp.lt.s32.totalorder %s201_s29, %s201_s29 }
   0xd   :  { %p208_p6 = por %p207_p5, %p206_p4 }
   0xf   :  { %p209_p7 = pnand %p208_p6, %p202_p3 }
  0x11   :  { %212 = shalt.err (!%p209_p7)
}
  0x12   :  { %23 = dma.hbm_to_vmem [thread:$0]  %s353_s0, 128, %s21_s19, [#allocation3]  }
  0x13   :  { %s213_s9 = scalar_lea.hbm %s354_s1, 512 }
  0x14   :  { %p214_p8 = scmp.ne.s32.totalorder %s354_s1, %s213_s9  ;;  %p217_p9 = scmp.lt.u32.totalorder %s213_s9, %s354_s1 }
  0x16   :  { %p219_p10 = pnand %p217_p9, %p214_p8 }
  0x18   :  { %222 = shalt.err (!%p219_p10)
}
  0x19   :  { %s223_s14 = scalar_lea.vmem %s301_s21, 512  ;;  %p228_p12 = scmp.lt.s32.totalorder %s301_s21, %s301_s21 }
  0x1a   :  { %p224_p11 = scmp.ne.s32.totalorder %s301_s21, %s223_s14  ;;  %p229_p13 = scmp.lt.s32.totalorder %s223_s14, %s223_s14 }
  0x1c   :  { %p230_p0 = por %p229_p13, %p228_p12 }
  0x1e   :  { %p231_p1 = pnand %p230_p0, %p224_p11 }
  0x20   :  { %234 = shalt.err (!%p231_p1)
}
  0x21   :  { %s265_s0 = smov 128   ;;  %s266_s15 = smov 8  }
  0x22   :  { %35 = dma.hbm_to_vmem [thread:$0]  %s354_s1, 512, %s301_s21, [#allocation6], %s265_s0, %s265_s0, %s266_s15  }
  0x23   :  { %257 = dma.done.wait [#allocation3], 128  }
  0x24   :  { %258 = vsyncadd [#allocation3], 4294967168 }
  0x25   :  { %259 = dma.done.wait [#allocation6], 512  }
  0x26   :  { %260 = vsyncadd [#allocation6], 4294966784  ;;  %v267_v0 = vmov 0.0|0.0   ;;  %vm268_vm0 = vmmov 0   ;;  %v269_v1 = vmov 0.0   ;;  %v47_v2 = vld [vmem:[#allocation5] sm:$0xff] }
  0x27   :  { %177 = vmatprep.subr.bf16.mxu0 %v267_v0  ;;  %174 = vmatprep.mubr.msk.f32.mxu0 %vm268_vm0, %v269_v1  ;;  %v48_v3 = vld [vmem:[#allocation5 + $0x8] sm:$0xff]  ;;  %v49_v4 = vld [vmem:[#allocation5 + $0x10] sm:$0xff]  ;;  %v50_v6 = vld [vmem:[#allocation5 + $0x18] sm:$0xff]  ;;  %vm58_vm1 = vcmask 261120   ;;  %s270_s21 = smov [#allocation7]  }
  0x28   :  { %v178_v5 = vpack.c.bf16 %v48_v3, %v47_v2  ;;  %v181_v7 = vpack.c.bf16 %v50_v6, %v49_v4  ;;  %v46_v8 = vld [vmem:[#allocation2] sm:$0xff]  ;;  %s145_s22 = sshll.u32 %s270_s21, 4  ;;  %s146_s22 = int_to_ptr.vmem [resolvable:$true] %s145_s22 }
  0x29   :  { %v159_v9 = vld [vmem:[%s355_s2] ss:$0 sm:$0xff]  ;;  %s235_s23 = scalar_lea.vmem %s146_s22, 128  ;;  %p240_p3 = scmp.lt.s32.totalorder %s146_s22, %s146_s22 }
  0x2a   :  { %179 = vmatpush3.bf16.msra.mxu0 %v178_v5  ;;  %v133_v11 = vld [vmem:[%s356_s3] sm:$0xff]  ;;  %p236_p2 = scmp.ne.s32.totalorder %s146_s22, %s235_s23  ;;  %p241_p4 = scmp.lt.s32.totalorder %s235_s23, %s235_s23 }
  0x2b   :  { %180 = vmatprep.subr.bf16.mxu0 %v267_v0 }
  0x2c   :  { %p242_p5 = por %p241_p4, %p240_p3 }
  0x2e   :  { %182 = vmatpush3.bf16.msra.mxu0 %v181_v7  ;;  %p243_p6 = pnand %p242_p5, %p236_p2 }
  0x31   :  { %175 = vmatmul.mubr.msk.f32.vlgmr.msra.gmra.mrb[0].mxu0 %vm58_vm1, %v46_v8 }
 0x104   :  { %v128_v10 = vpop.f32.mrb[0].mxu0 }
 0x105   :  { %v129_v12 = vadd.f32 %v159_v9, %v128_v10  ;;  %v176_v13 = vpop.f32.mrb[1].mxu0 }
 0x107   :  { %132 = vst [vmem:[#allocation7] sm:$0xff] %v129_v12  ;;  %v134_v14 = vmul.f32 %v133_v11, %v129_v12 }
 0x109   :  { %135 = vadd.xlane.f32.xlu0 %v134_v14 }
 0x10a   :  { %246 = shalt.err (!%p243_p6)
}
 0x10b   :  { %s247_s25 = scalar_lea.hbm %s357_s4, 128 }
 0x10c   :  { %p248_p7 = scmp.ne.s32.totalorder %s357_s4, %s247_s25  ;;  %p251_p8 = scmp.lt.u32.totalorder %s247_s25, %s357_s4 }
 0x10e   :  { %p253_p9 = pnand %p251_p8, %p248_p7 }
 0x110   :  { %256 = shalt.err (!%p253_p9)
}
 0x111   :  { %148 = dma.vmem_to_hbm [thread:$0]  %s146_s22, 128, %s357_s4, [#allocation4]   ;;  %vm137_vm2 = vcmask 7168  }
 0x196   :  { %v136_v15 = vpop.xlane.xlu0 %135 }
 0x197   :  { %138 = vst.msk [vmem:[%s358_s5] sm:$0xff] %vm137_vm2, %v136_v15 }
 0x198   :  { %261 = dma.done.wait [#allocation4], 128  }
 0x199   :  { %262 = vsyncadd [#allocation4], 4294967168 }
 0x19a   :  { %156 = vsyncpa [#allocation3], 1 }
 0x19b   :  { %157 = vsyncpa [#allocation6], 1 }
 0x19c   :  { %158 = vsyncpa [#allocation4], 1 }

</bundles_post_ra>
